<compile_context>
chip_gen: v7x
topology: tpu7x:2x2x1
jax: 0.10.0
libtpu: 0.0.40
codegen_flags: <defaults>
</compile_context>

<pallas_src>
import math

import jax
import jax.numpy as jnp
from jax.experimental import pallas as pl
from jax.experimental.pallas import tpu as pltpu


def _make_layernorm_kernel(eps: float, d_model: int):
    inv_nm1 = 1.0 / float(max(d_model - 1, 1))  # Bessel correction (torch.std)

    def kernel(alpha_ref, bias_ref, x_ref, o_ref):
        # Scalar params live in SMEM; read once into locals (scalar path only).
        alpha = alpha_ref[0]
        bias = bias_ref[0]

        # x_ref block: (tile_rows, D) in VMEM.  All math is per-row, so any
        # garbage in the (masked-on-store) tail rows of a ragged last block is
        # harmless — it never crosses rows and never reaches HBM.
        x = x_ref[...].astype(jnp.float32)
        mean = jnp.mean(x, axis=-1, keepdims=True)
        diff = x - mean
        var = jnp.sum(diff * diff, axis=-1, keepdims=True) * inv_nm1
        std = jnp.sqrt(var)

        # Exact per-row divide (only tile_rows values; fully hidden under DMA),
        # alpha folded into the scale so the D-wide path is one multiply-add.
        scale = alpha / (std + eps)
        o_ref[...] = (diff * scale + bias).astype(o_ref.dtype)

    return kernel


def _num_tensorcores() -> int:
    """2 for v7x-class chips (the parallel grid axis is sharded over both
    TensorCores), 1 for v5e/v6e and anything unrecognized."""
    try:
        kind = jax.devices()[0].device_kind.lower()
    except Exception:
        return 1
    return 2 if "v7" in kind else 1


def _choose_tile_rows(rows: int, d_model: int, itemsize: int,
                      *, max_block_f32_bytes: int = 4 << 20) -> int:
    """Largest aligned row tile whose f32 working block stays <= ~4 MiB.

    The budget is counted in f32 because the in-kernel cast and the full-block
    `diff` intermediate are f32 even for bf16 inputs.  Double-buffered in+out
    plus ~2 full-block f32 intermediates is ~24 MiB at 4 MiB blocks, which is
    covered by the explicit vmem_limit_bytes below (v5e's 16 MiB default
    scoped limit would not be).
    """
    # Sublane alignment: 8 rows for 4-byte, 16 for 2-byte, 32 for 1-byte
    # dtypes (packed layouts hold 2/4 rows per sublane).
    align = max(8, 32 // max(1, itemsize))
    row_f32_bytes = d_model * 4
    max_rows = max(align, (max_block_f32_bytes // row_f32_bytes) // align * align)
    n_tc = _num_tensorcores()

    if rows <= max_rows:
        # Whole problem fits in one block.  Split across TensorCores only when
        # the chip actually has 2 of them and the halves stay aligned;
        # single-TC chips take one full-size step (no per-step overhead).
        if n_tc > 1 and rows >= n_tc * align:
            per = -(-rows // n_tc)                      # ceil(rows / n_tc)
            per = ((per + align - 1) // align) * align  # round up to alignment
            return min(per, max_rows)
        # Single block: the tile equals the full array dim, so any row count
        # (even one not divisible by 8) is a legal block shape.
        return rows

    tile = max_rows
    if n_tc > 1:
        # Keep the number of grid steps a multiple of the TC count so neither
        # core ends up with ~2x the work on small odd step counts.
        nt = pl.cdiv(rows, tile)
        if nt % n_tc:
            nt = ((nt + n_tc - 1) // n_tc) * n_tc
            tile = ((-(-rows // nt) + align - 1) // align) * align
    return tile


def layernorm_forward(x, alpha, bias, *, eps: float = 1e-6,
                      tile_rows: int | None = None):
    """Pallas implementation of LayerNormalization.forward.

    x:     (..., D)  — normalized over the last axis.
    alpha: (1,) f32  — nn.Parameter(torch.ones(1))
    bias:  (1,) f32  — nn.Parameter(torch.zeros(1))
    """
    orig_shape = x.shape
    D = orig_shape[-1]
    rows = math.prod(orig_shape[:-1]) if len(orig_shape) > 1 else 1
    x2d = x.reshape(rows, D)

    if tile_rows is None:
        tile_rows = _choose_tile_rows(rows, D, x.dtype.itemsize)

    # Ragged tail is handled by Pallas partial-block masking — no pad / slice
    # HBM round trip.
    num_tiles = pl.cdiv(rows, tile_rows)

    kernel = _make_layernorm_kernel(eps, D)

    # TODO(synk): if the surrounding model allows, lay out D as a multiple of
    # 128 upstream so the output stores are lane-dense (D=96 forces vst.msk).
    out2d = pl.pallas_call(
        kernel,
        out_shape=jax.ShapeDtypeStruct((rows, D), x.dtype),
        grid_spec=pltpu.PrefetchScalarGridSpec(
            num_scalar_prefetch=0,
            grid=(num_tiles,),
            in_specs=[
                pl.BlockSpec(memory_space=pltpu.MemorySpace.SMEM),  # alpha (1,)
                pl.BlockSpec(memory_space=pltpu.MemorySpace.SMEM),  # bias  (1,)
                pl.BlockSpec((tile_rows, D), lambda i: (i, 0)),
            ],
            out_specs=pl.BlockSpec((tile_rows, D), lambda i: (i, 0)),
        ),
        compiler_params=pltpu.CompilerParams(
            dimension_semantics=("parallel",),
            # Room for double-buffered ~4 MiB in+out blocks plus the
            # full-block f32 intermediates on every generation (v5e's 16 MiB
            # default scoped limit is too small; 48 MiB fits v7x's 64 MiB
            # physical VMEM with headroom).
            vmem_limit_bytes=48 << 20,
        ),
    )(alpha, bias, x2d)

    return out2d.reshape(orig_shape)


if __name__ == "__main__":
    key = jax.random.PRNGKey(0)
    k1, k2, k3 = jax.random.split(key, 3)

    # Deterministic parameter init, matching the module __init__:
    alpha = jnp.ones((1,), dtype=jnp.float32)   # nn.Parameter(torch.ones(1))
    bias = jnp.zeros((1,), dtype=jnp.float32)   # nn.Parameter(torch.zeros(1))
    eps = 1e-6

    def reference(x):
        xf = x.astype(jnp.float32)
        mean = xf.mean(axis=-1, keepdims=True)
        std = jnp.sqrt(jnp.sum((xf - mean) ** 2, axis=-1, keepdims=True)
                       / (xf.shape[-1] - 1))            # unbiased (ddof=1)
        return (alpha[0] * (xf - mean) / (std + eps) + bias[0]).astype(x.dtype)

    # Case 1: typical transformer activations (batch, seq, d_model).
    x1 = jax.random.normal(k1, (2, 8, 128), dtype=jnp.float32)
    out1 = layernorm_forward(x1, alpha, bias, eps=eps)
    jax.block_until_ready(out1)
    assert jnp.allclose(out1, reference(x1), atol=1e-4, rtol=1e-4), \
        "mismatch vs reference (case 1)"

    # Case 2: rows (=15) not a multiple of 8 and D (=96) not a multiple of 128
    # -> single full-extent block (no padding path any more).
    x2 = jax.random.normal(k2, (3, 5, 96), dtype=jnp.float32)
    out2 = layernorm_forward(x2, alpha, bias, eps=eps)
    jax.block_until_ready(out2)
    assert jnp.allclose(out2, reference(x2), atol=1e-4, rtol=1e-4), \
        "mismatch vs reference (case 2)"

    # Case 3: forced small tile -> multi-step grid with a ragged last block
    # handled by partial-block masking (rows=200, tile=64 -> 4 steps).
    x3 = jax.random.normal(k3, (4, 50, 128), dtype=jnp.float32)
    out3 = layernorm_forward(x3, alpha, bias, eps=eps, tile_rows=64)
    jax.block_until_ready(out3)
    assert jnp.allclose(out3, reference(x3), atol=1e-4, rtol=1e-4), \
        "mismatch vs reference (case 3)"

    print("KERNEL_OK")
</pallas_src>

<mosaic_0001>
module attributes {stable_mosaic.version = 11 : i64} {
  func.func @kernel(%arg0: i32, %arg1: memref<1xf32, #tpu.memory_space<smem>>, %arg2: memref<1xf32, #tpu.memory_space<smem>>, %arg3: memref<16x128xf32, #tpu.memory_space<vmem>>, %arg4: memref<16x128xf32, #tpu.memory_space<vmem>>) attributes {dimension_semantics = [#tpu.dimension_semantics<parallel>], iteration_bounds = array<i64: 1>, scalar_prefetch = 0 : i64, scratch_operands = 0 : i64, tpu.core_type = #tpu.core_type<tc>, window_params = [{transform_indices = @transform_0, window_bounds = array<i64: 1>}, {transform_indices = @transform_1, window_bounds = array<i64: 1>}, {transform_indices = @transform_2, window_bounds = array<i64: 16, 128>}, {transform_indices = @transform_3, window_bounds = array<i64: 16, 128>}]} {
    %c0 = arith.constant 0 : index
    %0 = memref.load %arg1[%c0] : memref<1xf32, #tpu.memory_space<smem>>
    %c0_0 = arith.constant 0 : index
    %1 = memref.load %arg2[%c0_0] : memref<1xf32, #tpu.memory_space<smem>>
    %c0_1 = arith.constant 0 : index
    %c0_2 = arith.constant 0 : index
    %2 = vector.load %arg3[%c0_1, %c0_2] : memref<16x128xf32, #tpu.memory_space<vmem>>, vector<16x128xf32>
    %cst = arith.constant dense<0.000000e+00> : vector<16xf32>
    %3 = vector.multi_reduction <add>, %2, %cst [1] : vector<16x128xf32> to vector<16xf32>
    %4 = vector.shape_cast %3 : vector<16xf32> to vector<16x1xf32>
    %cst_3 = arith.constant 1.280000e+02 : f32
    %5 = vector.broadcast %cst_3 : f32 to vector<16x1xf32>
    %6 = arith.divf %4, %5 : vector<16x1xf32>
    %7 = vector.broadcast %6 : vector<16x1xf32> to vector<16x128xf32>
    %8 = arith.subf %2, %7 : vector<16x128xf32>
    %9 = arith.mulf %8, %8 : vector<16x128xf32>
    %cst_4 = arith.constant dense<0.000000e+00> : vector<16xf32>
    %10 = vector.multi_reduction <add>, %9, %cst_4 [1] : vector<16x128xf32> to vector<16xf32>
    %11 = vector.shape_cast %10 : vector<16xf32> to vector<16x1xf32>
    %cst_5 = arith.constant 0.00787401571 : f32
    %12 = vector.broadcast %cst_5 : f32 to vector<16x1xf32>
    %13 = arith.mulf %11, %12 : vector<16x1xf32>
    %14 = math.sqrt %13 : vector<16x1xf32>
    %cst_6 = arith.constant 9.99999997E-7 : f32
    %15 = vector.broadcast %cst_6 : f32 to vector<16x1xf32>
    %16 = arith.addf %14, %15 : vector<16x1xf32>
    %17 = vector.broadcast %0 : f32 to vector<16x1xf32>
    %18 = arith.divf %17, %16 : vector<16x1xf32>
    %19 = vector.broadcast %18 : vector<16x1xf32> to vector<16x128xf32>
    %20 = arith.mulf %8, %19 : vector<16x128xf32>
    %21 = vector.broadcast %1 : f32 to vector<16x128xf32>
    %22 = arith.addf %20, %21 : vector<16x128xf32>
    %c0_7 = arith.constant 0 : index
    %c0_8 = arith.constant 0 : index
    %23 = vector.load %arg4[%c0_7, %c0_8] : memref<16x128xf32, #tpu.memory_space<vmem>>, vector<16x128xf32>
    tpu.vector_store %arg4[%c0_7, %c0_8], %22 {strides = array<i32>} : memref<16x128xf32, #tpu.memory_space<vmem>>, vector<16x128xf32>,
    return
  }
  func.func @transform_0(%arg0: i32) -> i32 {
    %c0_i32 = arith.constant 0 : i32
    %c0_i32_0 = arith.constant 0 : i32
    return %c0_i32 : i32
  }
  func.func @transform_1(%arg0: i32) -> i32 {
    %c0_i32 = arith.constant 0 : i32
    %c0_i32_0 = arith.constant 0 : i32
    return %c0_i32 : i32
  }
  func.func @transform_2(%arg0: i32) -> (i32, i32) {
    %c0_i32 = arith.constant 0 : i32
    %c0_i32_0 = arith.constant 0 : i32
    return %arg0, %c0_i32 : i32, i32
  }
  func.func @transform_3(%arg0: i32) -> (i32, i32) {
    %c0_i32 = arith.constant 0 : i32
    %c0_i32_0 = arith.constant 0 : i32
    return %arg0, %c0_i32 : i32, i32
  }
}

</mosaic_0001>

<bundles_post_ra>
// kernel: tpu_custom_call.1
= control target key start
LH: loop header
LB: loop body
LE: loop exit
PB: predicated region body
PF: predicated region fallthrough
CT: control target
= control target key end

     0   :  { %10 = vsyncpa [#allocation5], 0  ;;  %s217_s0 = inlined_call_operand.<no memory space> [shape: f32[1], index: 0, kind: input, shape index: {}]   ;;  %s218_s1 = inlined_call_operand.<no memory space> [shape: f32[1], index: 1, kind: input, shape index: {}]   ;;  %s219_s2 = inlined_call_operand.hbm [shape: f32[16,128], index: 2, kind: input, shape index: {}]   ;;  %s220_s3 = inlined_call_operand.hbm [shape: f32[16,128], index: 3, kind: output, shape index: {}]  }
   0x1   :  { %11 = vsyncpa [#allocation6], 0  ;;  %s157_s12 = smov [#allocation4]   ;;  %s109_s16 = scalar_lea.hbm %s219_s2, 256 }
   0x2   :  { %s21_s13 = sshll.u32 %s157_s12, 4  ;;  %p110_p0 = scmp.ne.s32.totalorder %s219_s2, %s109_s16  ;;  %s22_s13 = int_to_ptr.vmem [resolvable:$true] %s21_s13 }
   0x3   :  { %p113_p1 = scmp.lt.u32.totalorder %s109_s16, %s219_s2 }
   0x5   :  { %p115_p2 = pnand %p113_p1, %p110_p0 }
   0x7   :  { %118 = shalt.err (!%p115_p2)
}
   0x8   :  { %s119_s21 = scalar_lea.vmem %s22_s13, 256  ;;  %p124_p4 = scmp.lt.s32.totalorder %s22_s13, %s22_s13 }
   0x9   :  { %p120_p3 = scmp.ne.s32.totalorder %s22_s13, %s119_s21  ;;  %p125_p5 = scmp.lt.s32.totalorder %s119_s21, %s119_s21 }
   0xb   :  { %p126_p6 = por %p125_p5, %p124_p4 }
   0xd   :  { %p127_p7 = pnand %p126_p6, %p120_p3 }
   0xf   :  { %130 = shalt.err (!%p127_p7)
}
  0x10   :  { %s158_s22 = smov 128   ;;  %s159_s23 = smov 8  }
  0x11   :  { %27 = dma.hbm_to_vmem [thread:$0]  %s219_s2, 256, %s22_s13, [#allocation5], %s158_s22, %s158_s22, %s159_s23  }
  0x12   :  { %153 = dma.done.wait [#allocation5], 256  }
  0x13   :  { %154 = vsyncadd [#allocation5], 4294967040  ;;  %v33_v0 = vld [vmem:[#allocation4] sm:$0xff]  ;;  %v34_v1 = vld [vmem:[#allocation4 + $0x8] sm:$0xff]  ;;  %v68_v26 = vstv %s217_s0  ;;  %v75_v29 = vstv %s218_s1  ;;  %s160_s29 = smov [#allocation7]  }
  0x14   :  { %35 = vadd.xlane.f32.xlu0 %v33_v0  ;;  %s85_s30 = sshll.u32 %s160_s29, 4  ;;  %s86_s30 = int_to_ptr.vmem [resolvable:$true] %s85_s30 }
  0x15   :  { %s131_s4 = scalar_lea.vmem %s86_s30, 256  ;;  %p136_p9 = scmp.lt.s32.totalorder %s86_s30, %s86_s30 }
  0x16   :  { %p132_p8 = scmp.ne.s32.totalorder %s86_s30, %s131_s4  ;;  %p137_p10 = scmp.lt.s32.totalorder %s131_s4, %s131_s4 }
  0x18   :  { %37 = vadd.xlane.f32.xlu0 %v34_v1  ;;  %p138_p11 = por %p137_p10, %p136_p9 }
  0x1a   :  { %p139_p12 = pnand %p138_p11, %p132_p8 }
  0xa1   :  { %v36_v2 = vpop.xlane.xlu0 %35 }
  0xa2   :  { %v40_v3 = vmul.f32 0.0078125, %v36_v2 }
  0xa4   :  { %v42_v4 = vsub.f32 %v33_v0, %v40_v3 }
  0xa5   :  { %v38_v5 = vpop.xlane.xlu0 %37 }
  0xa6   :  { %v41_v6 = vmul.f32 0.0078125, %v38_v5  ;;  %v44_v7 = vmul.f32 %v42_v4, %v42_v4 }
  0xa8   :  { %v43_v8 = vsub.f32 %v34_v1, %v41_v6  ;;  %46 = vadd.xlane.f32.xlu1 %v44_v7 }
  0xaa   :  { %v45_v9 = vmul.f32 %v43_v8, %v43_v8 }
  0xac   :  { %48 = vadd.xlane.f32.xlu1 %v45_v9 }
 0x135   :  { %v47_v10 = vpop.xlane.xlu1 %46 }
 0x136   :  { %v50_v11 = vmul.f32 0.007874016, %v47_v10 }
 0x138   :  { %101 = vrsqrt.f32 %v50_v11  ;;  %vm54_vm0 = vcmp.eq.f32.partialorder %v50_v11, inf  ;;  %v57_v16 = vand.u32 2147483648, %v50_v11  ;;  %vm56_vm1 = vcmp.eq.f32.partialorder %v50_v11, 0.0 }
 0x139   :  { %v49_v12 = vpop.xlane.xlu1 %48 }
 0x13a   :  { %v51_v13 = vmul.f32 0.007874016, %v49_v12 }
 0x13c   :  { %103 = vrsqrt.f32 %v51_v13  ;;  %vm61_vm2 = vcmp.eq.f32.partialorder %v51_v13, inf  ;;  %v64_v22 = vand.u32 2147483648, %v51_v13  ;;  %vm63_vm3 = vcmp.eq.f32.partialorder %v51_v13, 0.0 }
 0x142   :  { %v102_v14 = vpop.eup %101 }
 0x143   :  { %v53_v15 = vmul.f32 %v102_v14, %v50_v11 }
 0x145   :  { %v55_v17 = vsel %vm54_vm0, %v50_v11, %v53_v15 }
 0x146   :  { %v104_v18 = vpop.eup %103  ;;  %v58_v19 = vsel %vm56_vm1, %v57_v16, %v55_v17 }
 0x147   :  { %v60_v20 = vmul.f32 %v104_v18, %v51_v13  ;;  %v66_v21 = vadd.f32 1e-06, %v58_v19 }
 0x149   :  { %v62_v23 = vsel %vm61_vm2, %v51_v13, %v60_v20  ;;  %105 = vrcp.f32 %v66_v21 }
 0x14a   :  { %v65_v24 = vsel %vm63_vm3, %v64_v22, %v62_v23 }
 0x14b   :  { %v67_v25 = vadd.f32 1e-06, %v65_v24 }
 0x14d   :  { %107 = vrcp.f32 %v67_v25 }
 0x153   :  { %v106_v27 = vpop.eup %105 }
 0x154   :  { %v70_v28 = vmul.f32 %v106_v27, %v68_v26 }
 0x156   :  { %v73_v30 = vmul.f32 %v70_v28, %v42_v4 }
 0x157   :  { %v108_v31 = vpop.eup %107 }
 0x158   :  { %v72_v32 = vmul.f32 %v108_v31, %v68_v26  ;;  %v76_v33 = vadd.f32 %v75_v29, %v73_v30 }
 0x15a   :  { %v74_v34 = vmul.f32 %v72_v32, %v43_v8  ;;  %78 = vst [vmem:[#allocation7] sm:$0xff] %v76_v33 }
 0x15c   :  { %v77_v35 = vadd.f32 %v75_v29, %v74_v34 }
 0x15e   :  { %79 = vst [vmem:[#allocation7 + $0x8] sm:$0xff] %v77_v35 }
 0x15f   :  { %142 = shalt.err (!%p139_p12)
}
 0x160   :  { %s143_s5 = scalar_lea.hbm %s220_s3, 256 }
 0x161   :  { %p144_p13 = scmp.ne.s32.totalorder %s220_s3, %s143_s5  ;;  %p147_p0 = scmp.lt.u32.totalorder %s143_s5, %s220_s3 }
 0x163   :  { %p149_p1 = pnand %p147_p0, %p144_p13 }
 0x165   :  { %152 = shalt.err (!%p149_p1)
}
 0x166   :  { %91 = dma.vmem_to_hbm [thread:$0]  %s86_s30, 256, %s220_s3, [#allocation6], %s158_s22, %s158_s22, %s159_s23  }
 0x167   :  { %155 = dma.done.wait [#allocation6], 256  }
 0x168   :  { %156 = vsyncadd [#allocation6], 4294967040 }
 0x169   :  { %95 = vsyncpa [#allocation5], 1 }
 0x16a   :  { %96 = vsyncpa [#allocation6], 1 }

</bundles_post_ra>
